<compile_context>
chip_gen: v5e
topology: v5e:2x2
jax: 0.10.0
libtpu: 0.0.40
codegen_flags: <defaults>
</compile_context>

<pallas_src>
import functools
import math

import jax
import jax.numpy as jnp
from jax.experimental import pallas as pl
from jax.experimental.pallas import tpu as pltpu

_LANE = 128


def _round_up(x, m):
    return ((x + m - 1) // m) * m


def _vmem_capacity_bytes():
    """Per-TensorCore VMEM capacity; conservative fallback if query fails."""
    try:
        info = pltpu.get_tpu_info()
        for name in ("vmem_capacity_bytes", "vmem_bytes"):
            cap = getattr(info, name, None)
            if cap:
                return int(cap)
    except Exception:
        pass
    return 64 << 20  # v7x per-TC VMEM (smallest of the targeted generations)


# ----------------------------------------------------------------------------
# Fused kernel: one grid step = g_tile model-groups, whole MLP depth.
# ----------------------------------------------------------------------------
def _fused_mlp_kernel(*refs, n_hidden_layers, skip_connections, compute_dtype):
    # With hidden stack   : x, w0, b0, wh, bh, wo, bo, out
    # Without (1 hidden)  : x, w0, b0,          wo, bo, out
    if n_hidden_layers >= 2:
        x_ref, w0_ref, b0_ref, wh_ref, bh_ref, wo_ref, bo_ref, o_ref = refs
    else:
        x_ref, w0_ref, b0_ref, wo_ref, bo_ref, o_ref = refs
        wh_ref = bh_ref = None
    f32 = jnp.float32

    # Layer 0 (input -> hidden): never has a skip connection (idx 0 is even).
    h = jnp.einsum("gbi,gio->gbo", x_ref[...], w0_ref[...],
                   preferred_element_type=f32)
    h = jnp.maximum(h + b0_ref[...], 0.0)                       # f32 epilogue

    # Hidden -> hidden layers (layer_idx = l + 1).  Static unroll: layer count
    # is small and known at trace time; weights are sliced per layer from the
    # group-major VMEM block (no full-stack load into vregs).
    for l in range(n_hidden_layers - 1):
        w_l = wh_ref[:, l, :, :]                                 # (g, HP, HP)
        b_l = bh_ref[:, l, :, :]                                 # (g, 1, HP)
        y = jnp.einsum("gbi,gio->gbo", h.astype(compute_dtype), w_l,
                       preferred_element_type=f32)
        y = y + b_l
        if skip_connections and ((l + 1) % 2 == 1):
            y = h + y            # relu(x + (xW + b)), matches the PyTorch order
        h = jnp.maximum(y, 0.0)

    # Output layer: no relu, no skip.
    y = jnp.einsum("gbi,gio->gbo", h.astype(compute_dtype), wo_ref[...],
                   preferred_element_type=f32)
    o_ref[...] = (y + bo_ref[...]).astype(o_ref.dtype)


def fused_parallel_mlp(x, w0, b0, wh, bh, wo, bo, *, n_hidden_layers,
                       skip_connections, g_tile, compute_dtype, vmem_cap,
                       out_dtype=jnp.float32):
    """x: (n_groups_p, b_p, in_pk) block-packed activations; returns f32 output."""
    n_groups_p, b_p, in_pk = x.shape
    h_pk = w0.shape[-1]
    out_pk = wo.shape[-1]
    l1 = n_hidden_layers - 1
    assert n_groups_p % g_tile == 0
    grid = n_groups_p // g_tile

    kernel = functools.partial(
        _fused_mlp_kernel,
        n_hidden_layers=n_hidden_layers,
        skip_connections=skip_connections,
        compute_dtype=compute_dtype,
    )

    # Per-step VMEM working set: double-buffered streamed blocks + f32 intermediates.
    cb = jnp.dtype(compute_dtype).itemsize
    per_group = (b_p * in_pk * cb
                 + in_pk * h_pk * cb + h_pk * 4
                 + l1 * (h_pk * h_pk * cb + h_pk * 4)
                 + h_pk * out_pk * cb + out_pk * 4
                 + b_p * out_pk * 4)
    interm = 5 * g_tile * b_p * h_pk * 4
    step_bytes = 2 * g_tile * per_group + interm
    # TODO(synk): replace with a layer grid axis + VMEM activation carry for
    # configurations whose per-step weights do not fit.
    assert step_bytes <= vmem_cap - (8 << 20), (
        "Per-step working set too large for this generation's VMEM; reduce "
        "g_tile or tile the layer axis.")
    vmem_limit = int(min(vmem_cap, max(32 << 20, step_bytes + (8 << 20))))

    in_specs = [
        pl.BlockSpec((g_tile, b_p, in_pk), lambda m: (m, 0, 0)),
        pl.BlockSpec((g_tile, in_pk, h_pk), lambda m: (m, 0, 0)),
        pl.BlockSpec((g_tile, 1, h_pk), lambda m: (m, 0, 0)),
    ]
    args = [x, w0, b0]
    if l1 >= 1:
        in_specs += [
            pl.BlockSpec((g_tile, l1, h_pk, h_pk), lambda m: (m, 0, 0, 0)),
            pl.BlockSpec((g_tile, l1, 1, h_pk), lambda m: (m, 0, 0, 0)),
        ]
        args += [wh, bh]
    in_specs += [
        pl.BlockSpec((g_tile, h_pk, out_pk), lambda m: (m, 0, 0)),
        pl.BlockSpec((g_tile, 1, out_pk), lambda m: (m, 0, 0)),
    ]
    args += [wo, bo]

    return pl.pallas_call(
        kernel,
        out_shape=jax.ShapeDtypeStruct((n_groups_p, b_p, out_pk), out_dtype),
        grid_spec=pltpu.PrefetchScalarGridSpec(
            num_scalar_prefetch=0,
            grid=(grid,),
            in_specs=in_specs,
            out_specs=pl.BlockSpec((g_tile, b_p, out_pk), lambda m: (m, 0, 0)),
        ),
        compiler_params=pltpu.CompilerParams(
            dimension_semantics=("parallel",),   # group tiles are independent
            vmem_limit_bytes=vmem_limit,
        ),
    )(*args)


# ----------------------------------------------------------------------------
# Parameter init (matches PyTorch ParallelLinearLayer exactly, in f32)
# ----------------------------------------------------------------------------
def init_parallel_linear(key, n_models, in_dim, out_dim, dtype=jnp.float32):
    stdv = 1.0 / math.sqrt(in_dim)
    kw, kb = jax.random.split(key)
    w = jax.random.uniform(kw, (n_models, in_dim, out_dim), dtype, -stdv, stdv)
    b = jax.random.uniform(kb, (n_models, 1, out_dim), dtype, -stdv, stdv)
    return w, b


def _pack_linear(w, b, G, n_groups, n_groups_p, row_pad, col_pad, wdtype):
    """Block-diagonally pack G models into one tile.

    w: (n_models, in_d, out_d) f32, b: (n_models, 1, out_d) f32
    -> wp: (n_groups_p, row_pad, col_pad) wdtype   (block-diag, zero padded)
       bp: (n_groups_p, 1, col_pad) f32            (lane-concatenated)
    """
    n_models, in_d, out_d = w.shape
    nm_pad = n_groups * G
    w = jnp.pad(w, ((0, nm_pad - n_models), (0, 0), (0, 0)))
    b = jnp.pad(b, ((0, nm_pad - n_models), (0, 0), (0, 0)))
    wg = w.reshape(n_groups, G, in_d, out_d)
    eye = jnp.eye(G, dtype=w.dtype)
    # bd[n, g, i, h, o] = w[n, g, i, o] * (g == h)  -> rows g*in_d+i, cols h*out_d+o
    bd = jnp.einsum("ngio,gh->ngiho", wg, eye).reshape(
        n_groups, G * in_d, G * out_d)
    wp = jnp.zeros((n_groups_p, row_pad, col_pad), wdtype)
    wp = wp.at[:n_groups, :G * in_d, :G * out_d].set(bd.astype(wdtype))
    bp = jnp.zeros((n_groups_p, 1, col_pad), jnp.float32)       # bias in f32
    bp = bp.at[:n_groups, :, :G * out_d].set(b.reshape(n_groups, 1, G * out_d))
    return wp, bp


class ParallelMLPs:
    """JAX/Pallas port of the PyTorch ParallelMLPs module (inference mode)."""

    def __init__(self, key, n_models, input_size, hidden_size, output_size,
                 n_hidden_layers, skip_connections, dropout,
                 compute_dtype=jnp.bfloat16):
        assert n_hidden_layers >= 1
        self.n_models = n_models
        self.input_size = input_size
        self.hidden_size = hidden_size
        self.output_size = output_size
        self.n_hidden_layers = n_hidden_layers
        self.skip_connections = skip_connections
        self.use_dropout = dropout > 0.0
        self.compute_dtype = compute_dtype

        keys = jax.random.split(key, n_hidden_layers + 1)
        # Unpadded f32 reference parameters (PyTorch-equivalent init).
        self.layers = [init_parallel_linear(keys[0], n_models, input_size,
                                            hidden_size)]
        for i in range(n_hidden_layers - 1):
            self.layers.append(init_parallel_linear(keys[i + 1], n_models,
                                                    hidden_size, hidden_size))
        self.output_layer = init_parallel_linear(keys[-1], n_models,
                                                 hidden_size, output_size)

        # ---- block-diagonal model packing (lane-dense hidden tiles) ----------
        self.G = G = max(1, _LANE // hidden_size)      # models per 128-lane group
        self.n_groups = n_groups = -(-n_models // G)
        self._sub = sub = 16 if jnp.dtype(compute_dtype).itemsize < 4 else 8
        self.h_pk = h_pk = _round_up(G * hidden_size, _LANE)   # packed hidden lanes
        self.in_pk = _round_up(G * input_size, sub)            # contraction: sublane pad only
        self.out_pk = G * output_size                          # tiny output, unpadded

        # ---- generation-aware group tile (g_tile) & VMEM budget ---------------
        self._vmem_cap = vmem_cap = _vmem_capacity_bytes()
        cb = jnp.dtype(compute_dtype).itemsize
        l1 = n_hidden_layers - 1
        per_group_fixed = (self.in_pk * h_pk * cb + h_pk * 4
                           + l1 * (h_pk * h_pk * cb + h_pk * 4)
                           + h_pk * self.out_pk * cb + self.out_pk * 4)
        b_nom = _round_up(256, sub)            # nominal batch used only for sizing
        per_group_io = b_nom * (self.in_pk * cb + self.out_pk * 4)
        per_group_interm = 5 * b_nom * h_pk * 4
        budget = int(vmem_cap * (0.6 if vmem_cap <= (64 << 20) else 0.75))
        max_by_vmem = max(
            1, budget // (2 * (per_group_fixed + per_group_io) + per_group_interm))
        # >=4 grid steps when possible (>=2 per v7x TensorCore -> DMA/compute overlap).
        self.g_tile = g_tile = int(max(1, min(max_by_vmem, max(1, n_groups // 4))))
        self.n_groups_p = n_groups_p = _round_up(n_groups, g_tile)

        # ---- prepack weights: block-diag, group-major layer stack, bf16 -------
        self.w0, self.b0 = _pack_linear(*self.layers[0], G, n_groups, n_groups_p,
                                        self.in_pk, h_pk, compute_dtype)
        if l1 >= 1:
            packed = [_pack_linear(w, b, G, n_groups, n_groups_p, h_pk, h_pk,
                                   compute_dtype) for (w, b) in self.layers[1:]]
            # group-major: one contiguous HBM slab per grid step
            self.wh = jnp.stack([p[0] for p in packed], axis=1)  # (Gp, L-1, HP, HP)
            self.bh = jnp.stack([p[1] for p in packed], axis=1)  # (Gp, L-1, 1, HP)
        else:
            self.wh = None
            self.bh = None
        self.wo, self.bo = _pack_linear(*self.output_layer, G, n_groups,
                                        n_groups_p, h_pk, self.out_pk,
                                        compute_dtype)

    def __call__(self, x):
        n_models, batch, in_dim = x.shape
        assert n_models == self.n_models and in_dim == self.input_size
        G, n_groups = self.G, self.n_groups
        b_p = _round_up(batch, self._sub)
        nm_pad = n_groups * G

        # Pack inputs: lane-concatenate the G models of each group.
        xp = jnp.pad(x.astype(self.compute_dtype),
                     ((0, nm_pad - n_models), (0, b_p - batch), (0, 0)))
        xp = xp.reshape(n_groups, G, b_p, in_dim)
        xp = xp.transpose(0, 2, 1, 3).reshape(n_groups, b_p, G * in_dim)
        xg = jnp.zeros((self.n_groups_p, b_p, self.in_pk), self.compute_dtype)
        xg = xg.at[:n_groups, :, :G * in_dim].set(xp)

        out = fused_parallel_mlp(
            xg, self.w0, self.b0, self.wh, self.bh, self.wo, self.bo,
            n_hidden_layers=self.n_hidden_layers,
            skip_connections=self.skip_connections,
            g_tile=self.g_tile,
            compute_dtype=self.compute_dtype,
            vmem_cap=self._vmem_cap,
            out_dtype=jnp.float32)

        # Unpack: (n_groups, batch, G*out) -> (n_models, batch, out)
        out = out[:n_groups, :batch, :G * self.output_size]
        out = out.reshape(n_groups, batch, G, self.output_size)
        out = out.transpose(0, 2, 1, 3).reshape(n_groups * G, batch,
                                                self.output_size)
        return out[:n_models]


# ----------------------------------------------------------------------------
# Pure-JAX reference (same precision policy: bf16 MXU inputs, f32 accum/epilogue)
# ----------------------------------------------------------------------------
def _reference_forward(model, x):
    cd = model.compute_dtype
    a = x.astype(cd)       # activation presented to the matmul
    h = None               # f32 post-relu activation (for skip adds)
    for layer_idx, (w, b) in enumerate(model.layers):
        y = jnp.einsum("mbi,mio->mbo", a, w.astype(cd),
                       preferred_element_type=jnp.float32) + b
        if model.skip_connections and layer_idx % 2:
            y = h + y
        h = jnp.maximum(y, 0.0)
        a = h.astype(cd)
    w, b = model.output_layer
    return jnp.einsum("mbi,mio->mbo", a, w.astype(cd),
                      preferred_element_type=jnp.float32) + b


if __name__ == "__main__":
    n_models = 8
    batch = 16
    input_size = 16
    hidden_size = 32
    output_size = 8
    n_hidden_layers = 3
    skip_connections = True
    dropout = 0.0

    root = jax.random.PRNGKey(0)
    k_params, k_x = jax.random.split(root)

    model = ParallelMLPs(k_params, n_models, input_size, hidden_size,
                         output_size, n_hidden_layers, skip_connections,
                         dropout)

    x = jax.random.normal(k_x, (n_models, batch, input_size), jnp.float32)

    out = jax.block_until_ready(model(x))
    ref = jax.block_until_ready(_reference_forward(model, x))

    assert out.shape == (n_models, batch, output_size)
    max_err = float(jnp.max(jnp.abs(out - ref)))
    assert jnp.allclose(out, ref, atol=2e-3, rtol=2e-3), max_err

    print("KERNEL_OK")
</pallas_src>

<mosaic_0001>
module attributes {stable_mosaic.version = 11 : i64} {
  func.func @_fused_mlp_kernel(%arg0: i32, %arg1: memref<1x16x64xbf16, #tpu.memory_space<vmem>>, %arg2: memref<1x64x128xbf16, #tpu.memory_space<vmem>>, %arg3: memref<1x1x128xf32, #tpu.memory_space<vmem>>, %arg4: memref<1x2x128x128xbf16, #tpu.memory_space<vmem>>, %arg5: memref<1x2x1x128xf32, #tpu.memory_space<vmem>>, %arg6: memref<1x128x32xbf16, #tpu.memory_space<vmem>>, %arg7: memref<1x1x32xf32, #tpu.memory_space<vmem>>, %arg8: memref<1x16x32xf32, #tpu.memory_space<vmem>>) attributes {dimension_semantics = [#tpu.dimension_semantics<parallel>], iteration_bounds = array<i64: 2>, scalar_prefetch = 0 : i64, scratch_operands = 0 : i64, tpu.core_type = #tpu.core_type<tc>, window_params = [{transform_indices = @transform_0, window_bounds = array<i64: 1, 16, 64>}, {transform_indices = @transform_1, window_bounds = array<i64: 1, 64, 128>}, {transform_indices = @transform_2, window_bounds = array<i64: 1, 1, 128>}, {transform_indices = @transform_3, window_bounds = array<i64: 1, 2, 128, 128>}, {transform_indices = @transform_4, window_bounds = array<i64: 1, 2, 1, 128>}, {transform_indices = @transform_5, window_bounds = array<i64: 1, 128, 32>}, {transform_indices = @transform_6, window_bounds = array<i64: 1, 1, 32>}, {transform_indices = @transform_7, window_bounds = array<i64: 1, 16, 32>}]} {
    %c0 = arith.constant 0 : index
    %c0_0 = arith.constant 0 : index
    %c0_1 = arith.constant 0 : index
    %0 = vector.load %arg1[%c0, %c0_0, %c0_1] : memref<1x16x64xbf16, #tpu.memory_space<vmem>>, vector<1x16x64xbf16>
    %c0_2 = arith.constant 0 : index
    %c0_3 = arith.constant 0 : index
    %c0_4 = arith.constant 0 : index
    %1 = vector.load %arg2[%c0_2, %c0_3, %c0_4] : memref<1x64x128xbf16, #tpu.memory_space<vmem>>, vector<1x64x128xbf16>
    "tpu.trace_start"() <{level = 10 : i32, message = "gbi,gio->gbo"}> : () -> ()
    %cst = arith.constant dense<0.000000e+00> : vector<1x16x128xf32>
    %2 = tpu.matmul %0, %1, %cst {dimension_numbers = #tpu.dot_dimension_numbers<[2], [1], [1], [2], [0, 0, 0, 1, 1, 2], [0], [0]>} : vector<1x16x64xbf16>, vector<1x64x128xbf16>, vector<1x16x128xf32> -> vector<1x16x128xf32>
    "tpu.trace_stop"() : () -> ()
    %c0_5 = arith.constant 0 : index
    %c0_6 = arith.constant 0 : index
    %c0_7 = arith.constant 0 : index
    %3 = vector.load %arg3[%c0_5, %c0_6, %c0_7] : memref<1x1x128xf32, #tpu.memory_space<vmem>>, vector<1x1x128xf32>
    %4 = vector.broadcast %3 : vector<1x1x128xf32> to vector<1x16x128xf32>
    %5 = arith.addf %2, %4 : vector<1x16x128xf32>
    %cst_8 = arith.constant 0.000000e+00 : f32
    %6 = vector.broadcast %cst_8 : f32 to vector<1x16x128xf32>
    %7 = arith.maximumf %5, %6 : vector<1x16x128xf32>
    %c0_9 = arith.constant 0 : index
    %c0_10 = arith.constant 0 : index
    %c0_11 = arith.constant 0 : index
    %c0_12 = arith.constant 0 : index
    %8 = vector.load %arg4[%c0_9, %c0_10, %c0_11, %c0_12] : memref<1x2x128x128xbf16, #tpu.memory_space<vmem>>, vector<1x1x128x128xbf16>
    %9 = vector.shape_cast %8 : vector<1x1x128x128xbf16> to vector<1x128x128xbf16>
    %c0_13 = arith.constant 0 : index
    %c0_14 = arith.constant 0 : index
    %c0_15 = arith.constant 0 : index
    %c0_16 = arith.constant 0 : index
    %10 = vector.load %arg5[%c0_13, %c0_14, %c0_15, %c0_16] : memref<1x2x1x128xf32, #tpu.memory_space<vmem>>, vector<1x1x1x128xf32>
    %11 = vector.shape_cast %10 : vector<1x1x1x128xf32> to vector<1x1x128xf32>
    %12 = arith.truncf %7 : vector<1x16x128xf32> to vector<1x16x128xbf16>
    "tpu.trace_start"() <{level = 10 : i32, message = "gbi,gio->gbo"}> : () -> ()
    %cst_17 = arith.constant dense<0.000000e+00> : vector<1x16x128xf32>
    %13 = tpu.matmul %12, %9, %cst_17 {dimension_numbers = #tpu.dot_dimension_numbers<[2], [1], [1], [2], [0, 0, 0, 1, 1, 2], [0], [0]>} : vector<1x16x128xbf16>, vector<1x128x128xbf16>, vector<1x16x128xf32> -> vector<1x16x128xf32>
    "tpu.trace_stop"() : () -> ()
    %14 = vector.broadcast %11 : vector<1x1x128xf32> to vector<1x16x128xf32>
    %15 = arith.addf %13, %14 : vector<1x16x128xf32>
    %16 = arith.addf %7, %15 : vector<1x16x128xf32>
    %cst_18 = arith.constant 0.000000e+00 : f32
    %17 = vector.broadcast %cst_18 : f32 to vector<1x16x128xf32>
    %18 = arith.maximumf %16, %17 : vector<1x16x128xf32>
    %c0_19 = arith.constant 0 : index
    %c1 = arith.constant 1 : index
    %c0_20 = arith.constant 0 : index
    %c0_21 = arith.constant 0 : index
    %19 = vector.load %arg4[%c0_19, %c1, %c0_20, %c0_21] : memref<1x2x128x128xbf16, #tpu.memory_space<vmem>>, vector<1x1x128x128xbf16>
    %20 = vector.shape_cast %19 : vector<1x1x128x128xbf16> to vector<1x128x128xbf16>
    %c0_22 = arith.constant 0 : index
    %c1_23 = arith.constant 1 : index
    %c0_24 = arith.constant 0 : index
    %c0_25 = arith.constant 0 : index
    %21 = vector.load %arg5[%c0_22, %c1_23, %c0_24, %c0_25] : memref<1x2x1x128xf32, #tpu.memory_space<vmem>>, vector<1x1x1x128xf32>
    %22 = vector.shape_cast %21 : vector<1x1x1x128xf32> to vector<1x1x128xf32>
    %23 = arith.truncf %18 : vector<1x16x128xf32> to vector<1x16x128xbf16>
    "tpu.trace_start"() <{level = 10 : i32, message = "gbi,gio->gbo"}> : () -> ()
    %cst_26 = arith.constant dense<0.000000e+00> : vector<1x16x128xf32>
    %24 = tpu.matmul %23, %20, %cst_26 {dimension_numbers = #tpu.dot_dimension_numbers<[2], [1], [1], [2], [0, 0, 0, 1, 1, 2], [0], [0]>} : vector<1x16x128xbf16>, vector<1x128x128xbf16>, vector<1x16x128xf32> -> vector<1x16x128xf32>
    "tpu.trace_stop"() : () -> ()
    %25 = vector.broadcast %22 : vector<1x1x128xf32> to vector<1x16x128xf32>
    %26 = arith.addf %24, %25 : vector<1x16x128xf32>
    %cst_27 = arith.constant 0.000000e+00 : f32
    %27 = vector.broadcast %cst_27 : f32 to vector<1x16x128xf32>
    %28 = arith.maximumf %26, %27 : vector<1x16x128xf32>
    %29 = arith.truncf %28 : vector<1x16x128xf32> to vector<1x16x128xbf16>
    %c0_28 = arith.constant 0 : index
    %c0_29 = arith.constant 0 : index
    %c0_30 = arith.constant 0 : index
    %30 = vector.load %arg6[%c0_28, %c0_29, %c0_30] : memref<1x128x32xbf16, #tpu.memory_space<vmem>>, vector<1x128x32xbf16>
    "tpu.trace_start"() <{level = 10 : i32, message = "gbi,gio->gbo"}> : () -> ()
    %cst_31 = arith.constant dense<0.000000e+00> : vector<1x16x32xf32>
    %31 = tpu.matmul %29, %30, %cst_31 {dimension_numbers = #tpu.dot_dimension_numbers<[2], [1], [1], [2], [0, 0, 0, 1, 1, 2], [0], [0]>} : vector<1x16x128xbf16>, vector<1x128x32xbf16>, vector<1x16x32xf32> -> vector<1x16x32xf32>
    "tpu.trace_stop"() : () -> ()
    %c0_32 = arith.constant 0 : index
    %c0_33 = arith.constant 0 : index
    %c0_34 = arith.constant 0 : index
    %32 = vector.load %arg7[%c0_32, %c0_33, %c0_34] : memref<1x1x32xf32, #tpu.memory_space<vmem>>, vector<1x1x32xf32>
    %33 = vector.broadcast %32 : vector<1x1x32xf32> to vector<1x16x32xf32>
    %34 = arith.addf %31, %33 : vector<1x16x32xf32>
    %c0_35 = arith.constant 0 : index
    %c0_36 = arith.constant 0 : index
    %c0_37 = arith.constant 0 : index
    %35 = vector.load %arg8[%c0_35, %c0_36, %c0_37] : memref<1x16x32xf32, #tpu.memory_space<vmem>>, vector<1x16x32xf32>
    tpu.vector_store %arg8[%c0_35, %c0_36, %c0_37], %34 {strides = array<i32>} : memref<1x16x32xf32, #tpu.memory_space<vmem>>, vector<1x16x32xf32>,
    return
  }
  func.func @transform_0(%arg0: i32) -> (i32, i32, i32) {
    %c0_i32 = arith.constant 0 : i32
    %c0_i32_0 = arith.constant 0 : i32
    %c0_i32_1 = arith.constant 0 : i32
    return %arg0, %c0_i32, %c0_i32_0 : i32, i32, i32
  }
  func.func @transform_1(%arg0: i32) -> (i32, i32, i32) {
    %c0_i32 = arith.constant 0 : i32
    %c0_i32_0 = arith.constant 0 : i32
    %c0_i32_1 = arith.constant 0 : i32
    return %arg0, %c0_i32, %c0_i32_0 : i32, i32, i32
  }
  func.func @transform_2(%arg0: i32) -> (i32, i32, i32) {
    %c0_i32 = arith.constant 0 : i32
    %c0_i32_0 = arith.constant 0 : i32
    %c0_i32_1 = arith.constant 0 : i32
    return %arg0, %c0_i32, %c0_i32_0 : i32, i32, i32
  }
  func.func @transform_3(%arg0: i32) -> (i32, i32, i32, i32) {
    %c0_i32 = arith.constant 0 : i32
    %c0_i32_0 = arith.constant 0 : i32
    %c0_i32_1 = arith.constant 0 : i32
    %c0_i32_2 = arith.constant 0 : i32
    return %arg0, %c0_i32, %c0_i32_0, %c0_i32_1 : i32, i32, i32, i32
  }
  func.func @transform_4(%arg0: i32) -> (i32, i32, i32, i32) {
    %c0_i32 = arith.constant 0 : i32
    %c0_i32_0 = arith.constant 0 : i32
    %c0_i32_1 = arith.constant 0 : i32
    %c0_i32_2 = arith.constant 0 : i32
    return %arg0, %c0_i32, %c0_i32_0, %c0_i32_1 : i32, i32, i32, i32
  }
  func.func @transform_5(%arg0: i32) -> (i32, i32, i32) {
    %c0_i32 = arith.constant 0 : i32
    %c0_i32_0 = arith.constant 0 : i32
    %c0_i32_1 = arith.constant 0 : i32
    return %arg0, %c0_i32, %c0_i32_0 : i32, i32, i32
  }
  func.func @transform_6(%arg0: i32) -> (i32, i32, i32) {
    %c0_i32 = arith.constant 0 : i32
    %c0_i32_0 = arith.constant 0 : i32
    %c0_i32_1 = arith.constant 0 : i32
    return %arg0, %c0_i32, %c0_i32_0 : i32, i32, i32
  }
  func.func @transform_7(%arg0: i32) -> (i32, i32, i32) {
    %c0_i32 = arith.constant 0 : i32
    %c0_i32_0 = arith.constant 0 : i32
    %c0_i32_1 = arith.constant 0 : i32
    return %arg0, %c0_i32, %c0_i32_0 : i32, i32, i32
  }
}

</mosaic_0001>

<bundles_post_ra>
// kernel: tpu_custom_call.1
= control target key start
LH: loop header
LB: loop body
LE: loop exit
PB: predicated region body
PF: predicated region fallthrough
CT: control target
= control target key end

     0   :  { %12 = vsyncpa [#allocation3], 0  ;;  %s1482_s0 = inlined_call_operand.vmem [shape: bf16[2,16,64], index: 0, kind: input, shape index: {}]   ;;  %s1483_s1 = inlined_call_operand.vmem [shape: bf16[2,64,128], index: 1, kind: input, shape index: {}]   ;;  %s1484_s2 = inlined_call_operand.vmem [shape: f32[2,1,128], index: 2, kind: input, shape index: {}]   ;;  %s1485_s3 = inlined_call_operand.hbm [shape: bf16[2,2,128,128], index: 3, kind: input, shape index: {}]   ;;  %s1486_s4 = inlined_call_operand.vmem [shape: f32[2,2,1,128], index: 4, kind: input, shape index: {}]   ;;  %s1487_s5 = inlined_call_operand.vmem [shape: bf16[2,128,32], index: 5, kind: input, shape index: {}]   ;;  %s1488_s6 = inlined_call_operand.vmem [shape: f32[2,1,32], index: 6, kind: input, shape index: {}]   ;;  %s1489_s7 = inlined_call_operand.hbm [shape: f32[2,16,32], index: 7, kind: output, shape index: {}]  }
   0x1   :  { %14 = vsyncpa [#allocation3 + $0x1], 0 }
   0x2   :  { %15 = vsyncpa [#allocation4], 0 }
   0x3   :  { %17 = vsyncpa [#allocation4 + $0x1], 0  ;;  %s1289_s24 = smov 0   ;;  %s1291_s25 = smov 0  }
   0x4   :  { %s1293_s26 = smov 0   ;;  %s1295_s27 = smov 0  }
   0x5 LB: > { %s1310_s28 = sadd.s32 4294967295, %s1243_s27   ;;  %s904_s29 = sadd.s32 4294967294, %s1243_s27   ;;  %s1243_s27 = sphi %s1295_s27, %s1501_s27   ;;  %s1239_s26 = sphi %s1293_s26, %s1500_s26   ;;  %s1235_s25 = sphi %s1291_s25, %s1499_s25   ;;  %s1231_s24 = sphi %s1289_s24, %s1498_s24  }
   0x6   : > { %s1314_s30 = sadd.s32 1, %s1243_s27   ;;  %s108_s8 = sadd.s32 1, %s1239_s26 }
   0x7   : > { %s105_s9 = ssub.s32 %s1243_s27, %s1314_s30  ;;  %p115_p0 = scmp.ne.s32.totalorder %s1239_s26, %s1235_s25 }
   0x8   : > { %p106_p1 = scmp.eq.s32.totalorder %s105_s9, 0  ;;  %p116_p2 = scmp.eq.s32.totalorder %s1243_s27, 0 }
   0x9   : > { %p121_p3 = scmp.ne.s32.totalorder %s1235_s25, %s1231_s24  ;;  %p122_p4 = scmp.eq.s32.totalorder %s1310_s28, 0 }
   0xa   : > { %s1326_s10 = scalar_select %p106_p1, %s1239_s26, %s108_s8  }
   0xb   : > { %p1328_p5 = por %p116_p2, %p115_p0  ;;  %p1332_p6 = por %p122_p4, %p121_p3 }
   0xc   : > { %1490 = sst [smem:[#allocation8_spill]] %s1326_s10  ;;  %p223_p7 = scmp.eq.s32.totalorder %s1310_s28, 1 }
   0xd   : > { %p229_p8 = scmp.eq.s32.totalorder %s904_s29, 1  ;;  %p1105_p10 = scmp.lt.s32.totalorder %s1243_s27, 2 }
   0xe   : > { %p1339_p11 = por %p223_p7, %p115_p0  ;;  %s271_s15 = sand.u32 1, %s1239_s26  }
   0xf   : > { %p1343_p12 = por %p229_p8, %p121_p3  ;;  %s1059_s16 = sshll.u32 %s1243_s27, 7 }
  0x10   : > { %s907_s17 = sshll.u32 %s271_s15, 7  ;;  %s280_s20 = scalar_lea.hbm %s1485_s3, %s1059_s16 }
  0x11   : > { %s281_s21 = sshll.u32 %s280_s20, 4  ;;  %s275_s22 = scalar_lea.vmem [#allocation2], %s907_s17  ;;  %s282_s21 = int_to_ptr.hbm [resolvable:$true] %s281_s21 }
  0x12   : > { %s283_s23 = sshll.u32 %s275_s22, 4  ;;  %p1354_p13 = pnand %p1105_p10, %p1328_p5  ;;  %s284_s23 = int_to_ptr.vmem [resolvable:$true] %s283_s23 }
  0x13   : > { %p910_p0 = scmp.ge.s32.totalorder %s1243_s27, 1  ;;  %p312_p1 = scmp.lt.s32.totalorder %s1243_s27, 3 }
  0x14   : > { %s272_s8 = scalar_lea.sflag [#allocation3], %s271_s15  ;;  %s1147_s9 = sshra.s32 %s282_s21, 4  ;;  %s1148_s9 = int_to_ptr.hbm [resolvable:$true] %s1147_s9 }
  0x15   : > { %s1149_s10 = scalar_lea.hbm %s1148_s9, 128  ;;  %p1151_p3 = pneg %p1354_p13 }
  0x16   : > { %p1150_p2 = scmp.ne.s32.totalorder %s1148_s9, %s1149_s10  ;;  %s1154_s11 = scalar_lea.hbm %s1485_s3, 256 }
  0x17   : > { %p1155_p5 = scmp.lt.s32.totalorder %s1148_s9, %s1485_s3  ;;  %p1156_p8 = scmp.lt.s32.totalorder %s1154_s11, %s1149_s10 }
  0x18   : > { %p1152_p4 = pnand %p1151_p3, %p1150_p2 }
  0x19   : > { %p1157_p10 = por %p1156_p8, %p1155_p5 }
  0x1a   : > { %p1153_p7 = pneg %p1152_p4 }
  0x1c   : > { %p1158_p9 = pnand %p1157_p10, %p1153_p7 }
  0x1e   : > { %1161 = shalt.err (!%p1158_p9)
}
  0x1f   : > { %s1245_s15 = smov 64   ;;  %s1246_s20 = smov 4  }
  0x20   : > { %1100 = dma.hbm_to_vmem [thread:$0]  (!%p1354_p13), %s282_s21, 2048, %s284_s23, %s272_s8, %s1245_s15, %s1245_s15, %s1246_s20  }
  0x21   : > { %p313_p2 = pnand %p910_p0, %p312_p1 }
  0x22   : > { %s1375_s22 = sand.u32 (!%p313_p2), 1, %s1235_s25  }
  0x23   : > { %316 = sbr.rel (%p313_p2) target bundleno = 649 (0x289), region = 48  ;;  %s911_s10 = sshll.u32 (!%p313_p2), %s1375_s22, 7 }
  0x24   : > { %s319_s9 = scalar_lea.sflag (!%p313_p2), [#allocation3], %s1375_s22  ;;  %s1379_s16 = scalar_lea.vmem (!%p313_p2), [#allocation2], %s911_s10 }
  0x28   : > { %1222 = dma.done.wait (%p1332_p6), %s319_s9, 2048  }
  0x29   : > { %1224 = vsyncadd (%p1332_p6), %s319_s9, 4294965248  ;;  %p379_p9 = scmp.lt.s32.totalorder %s1310_s28, 1  ;;  %v1075_v1 = vld [vmem:[%s1379_s16 + $0x38] sm:$0xff]  ;;  %v1074_v3 = vld [vmem:[%s1379_s16 + $0x30] sm:$0xff]  ;;  %vm448_vm0 = vcmask 523264   ;;  %vm746_vm1 = vcmask 261120  }
  0x2a   : > { %544 = vmatpush.bf16.msra.mxu1 %v1075_v1  ;;  %v1073_v5 = vld [vmem:[%s1379_s16 + $0x28] sm:$0xff]  ;;  %v1072_v8 = vld [vmem:[%s1379_s16 + $0x20] sm:$0xff]  ;;  %v1071_v9 = vld [vmem:[%s1379_s16 + $0x18] sm:$0xff]  ;;  %s1197_s20 = scalar_lea.hbm %s1489_s7, 32 }
  0x2b   : > { %s1387_s21 = scalar_select %p379_p9, %s1310_s28, 1  ;;  %v1070_v10 = vld [vmem:[%s1379_s16 + $0x10] sm:$0xff]  ;;  %v1069_v11 = vld [vmem:[%s1379_s16 + $0x8] sm:$0xff]  ;;  %v1068_v12 = vld [vmem:[%s1379_s16] sm:$0xff] }
  0x2c   : > { %v1083_v13 = vld [vmem:[%s1379_s16 + $0x78] sm:$0xff]  ;;  %v1082_v14 = vld [vmem:[%s1379_s16 + $0x70] sm:$0xff]  ;;  %v1081_v15 = vld [vmem:[%s1379_s16 + $0x68] sm:$0xff] }
  0x2d   : > { %s1061_s23 = sshll.u32 %s1387_s21, 5  ;;  %s391_s18 = scalar_lea.vmem %s1484_s2, %s1387_s21  ;;  %640 = vmatpush.bf16.msra.mxu2 %v1083_v13  ;;  %v1080_v28 = vld [vmem:[%s1379_s16 + $0x60] sm:$0xff]  ;;  %v1079_v29 = vld [vmem:[%s1379_s16 + $0x58] sm:$0xff]  ;;  %v1078_v30 = vld [vmem:[%s1379_s16 + $0x50] sm:$0xff] }
  0x2e   : > { %s388_s17 = scalar_lea.vmem %s1483_s1, %s1061_s23  ;;  %s1060_s19 = sshll.u32 %s1387_s21, 3  ;;  %545 = vmatpush.bf16.msra.mxu1 %v1074_v3  ;;  %v1143_v16 = vld [vmem:[%s391_s18] ss:$0 sm:$0xff]  ;;  %v1077_v31 = vld [vmem:[%s1379_s16 + $0x48] sm:$0xff] }
  0x2f   : > { %v1067_v0 = vld [vmem:[%s388_s17 + $0x18] sm:$0xff]  ;;  %v1066_v2 = vld [vmem:[%s388_s17 + $0x10] sm:$0xff]  ;;  %v1065_v4 = vld [vmem:[%s388_s17 + $0x8] sm:$0xff]  ;;  %s383_s10 = scalar_lea.vmem %s1482_s0, %s1060_s19  ;;  %s917_s9 = sshll.u32 %s1387_s21, 1 }
  0x30   : > { %456 = vmatpush.bf16.msra.mxu0 %v1067_v0  ;;  %v1064_v6 = vld [vmem:[%s388_s17] sm:$0xff]  ;;  %s1408_s8 = scalar_lea.vmem %s1486_s4, %s917_s9  ;;  %s1062_s11 = sshll.u32 %s1387_s21, 6 }
  0x31   : > { %v1063_v7 = vld [vmem:[%s383_s10] sm:$0xff]  ;;  %641 = vmatpush.bf16.msra.mxu2 %v1082_v14  ;;  %s1432_s15 = scalar_lea.vmem %s1487_s5, %s1062_s11  ;;  %s403_s10 = scalar_lea.vmem %s1488_s6, %s1387_s21 }
  0x32   : > { %546 = vmatpush.bf16.msra.mxu1 %v1073_v5  ;;  %v1076_v32 = vld [vmem:[%s1379_s16 + $0x40] sm:$0xff]  ;;  %v1091_v33 = vld [vmem:[%s1432_s15 + $0x38] sm:$0xff]  ;;  %v1090_v34 = vld [vmem:[%s1432_s15 + $0x30] sm:$0xff]  ;;  %s912_s21 = sshll.u32 %s1375_s22, 4  ;;  %s1092_s9 = sshll.u32 %s1310_s28, 4 }
  0x33   : > { %732 = vmatpush.bf16.msra.mxu3 %v1091_v33  ;;  %v1089_v35 = vld [vmem:[%s1432_s15 + $0x28] sm:$0xff]  ;;  %v1144_v36 = vld [vmem:[%s1408_s8] ss:$0 sm:$0xff]  ;;  %v1087_v51 = vld [vmem:[%s1432_s15 + $0x18] sm:$0xff]  ;;  %s378_s17 = scalar_lea.vmem [#allocation5], %s912_s21  ;;  %s750_s18 = scalar_lea.sflag [#allocation4], %s1375_s22 }
  0x34   : > { %457 = vmatpush.bf16.msra.mxu0 %v1066_v2  ;;  %v1088_v50 = vld [vmem:[%s1432_s15 + $0x20] sm:$0xff]  ;;  %v1086_v52 = vld [vmem:[%s1432_s15 + $0x10] sm:$0xff]  ;;  %v1085_v53 = vld [vmem:[%s1432_s15 + $0x8] sm:$0xff]  ;;  %s762_s12 = sshll.u32 %s378_s17, 4  ;;  %s763_s12 = int_to_ptr.vmem [resolvable:$true] %s762_s12 }
  0x35   : > { %642 = vmatpush.bf16.msra.mxu2 %v1081_v15  ;;  %v1084_v54 = vld [vmem:[%s1432_s15] sm:$0xff] }
  0x36   : > { %547 = vmatpush.bf16.msra.mxu1 %v1072_v8  ;;  %v1145_v55 = vld [vmem:[%s1408_s8 + $0x1] ss:$0 sm:$0xff]  ;;  %v1146_v3 = vld [vmem:[%s403_s10] ss:$0 sm:$0xff]  ;;  %s761_s8 = scalar_lea.hbm %s1489_s7, %s1092_s9 }
  0x37   : > { %733 = vmatpush.bf16.msra.mxu3 %v1090_v34  ;;  %s764_s11 = sshll.u32 %s761_s8, 4  ;;  %s765_s11 = int_to_ptr.hbm [resolvable:$true] %s764_s11 }
  0x38   : > { %458 = vmatpush.bf16.msra.mxu0 %v1065_v4  ;;  %s1191_s19 = sshra.s32 %s765_s11, 4  ;;  %s1192_s19 = int_to_ptr.hbm [resolvable:$true] %s1191_s19 }
  0x39   : > { %643 = vmatpush.bf16.msra.mxu2 %v1080_v28  ;;  %s1193_s28 = scalar_lea.hbm %s1192_s19, 16  ;;  %p1198_p1 = scmp.lt.s32.totalorder %s1192_s19, %s1489_s7 }
  0x3a   : > { %548 = vmatpush.bf16.msra.mxu1 %v1071_v9  ;;  %p1194_p6 = scmp.ne.s32.totalorder %s1192_s19, %s1193_s28  ;;  %p1199_p3 = scmp.lt.s32.totalorder %s1197_s20, %s1193_s28 }
  0x3b   : > { %734 = vmatpush.bf16.msra.mxu3 %v1089_v35 }
  0x3c   : > { %459 = vmatpush.bf16.msra.mxu0 %v1064_v6  ;;  %p1195_p13 = pnand %p1194_p6, %p1339_p11  ;;  %p1200_p4 = por %p1199_p3, %p1198_p1 }
  0x3d   : > { %644 = vmatpush.bf16.msra.mxu2 %v1079_v29 }
  0x3e   : > { %549 = vmatpush.bf16.msra.mxu1 %v1070_v10  ;;  %p1196_p0 = pneg %p1195_p13 }
  0x3f   : > { %940 = vmatmul.msk.bf16.vlgmr.msra.gmra.mxu0 %vm448_vm0, %v1063_v7  ;;  %735 = vmatpush.bf16.msra.mxu3 %v1088_v50 }
  0x40   : > { %p1201_p7 = pnand %p1200_p4, %p1196_p0 }
  0x41   : > { %645 = vmatpush.bf16.msra.mxu2 %v1078_v30 }
  0x42   : > { %550 = vmatpush.bf16.msra.mxu1 %v1069_v11 }
  0x43   : > { %736 = vmatpush.bf16.msra.mxu3 %v1087_v51 }
  0x45   : > { %646 = vmatpush.bf16.msra.mxu2 %v1077_v31 }
  0x46   : > { %551 = vmatpush.bf16.msra.mxu1 %v1068_v12 }
  0x47   : > { %737 = vmatpush.bf16.msra.mxu3 %v1086_v52 }
  0x49   : > { %647 = vmatpush.bf16.msra.mxu2 %v1076_v32 }
  0x4b   : > { %738 = vmatpush.bf16.msra.mxu3 %v1085_v53 }
  0x4f   : > { %739 = vmatpush.bf16.msra.mxu3 %v1084_v54 }
  0xbc   : > { %v461_v17 = vpop.f32.mrf.mxu0 }
  0xbd   : > { %v462_v18 = vadd.f32 %v1143_v16, %v461_v17 }
  0xbf   : > { %v466_v19 = vmax.f32 %v462_v18, 0.0 }
  0xc1   : > { %v485_v22 = vpack.c.bf16 %v466_v19, %v466_v19 }
  0xc3   : > { %v492_v25 = vunpack.c.l.b16 %v485_v22 }
  0xc4   : > { %v463_v20 = vpop.f32.mrf.mxu0 }
  0xc5   : > { %v464_v21 = vadd.f32 %v1143_v16, %v463_v20 }
  0xc7   : > { %v467_v23 = vmax.f32 %v464_v21, 0.0 }
  0xc9   : > { %v486_v24 = vpack.c.bf16 %v467_v23, %v467_v23 }
  0xcb   : > { %v493_v26 = vunpack.c.l.b16 %v486_v24 }
  0xcd   : > { %v494_v27 = vpack.c.b16 %v493_v26, %v492_v25 }
  0xcf   : > { %552 = vmatmul.bf16.vlgmr.msra.gmra.mxu1 %v494_v27 }
 0x14c   : > { %v553_v37 = vpop.f32.mrf.mxu1 }
 0x14d   : > { %v554_v38 = vadd.f32 %v1144_v36, %v553_v37 }
 0x14f   : > { %v558_v39 = vadd.f32 %v554_v38, %v466_v19 }
 0x151   : > { %v560_v41 = vmax.f32 %v558_v39, 0.0 }
 0x153   : > { %v581_v44 = vpack.c.bf16 %v560_v41, %v560_v41 }
 0x154   : > { %v555_v40 = vpop.f32.mrf.mxu1 }
 0x155   : > { %v556_v42 = vadd.f32 %v1144_v36, %v555_v40  ;;  %v588_v47 = vunpack.c.l.b16 %v581_v44 }
 0x157   : > { %v559_v43 = vadd.f32 %v556_v42, %v467_v23 }
 0x159   : > { %v561_v45 = vmax.f32 %v559_v43, 0.0 }
 0x15b   : > { %v582_v46 = vpack.c.bf16 %v561_v45, %v561_v45 }
 0x15d   : > { %v589_v48 = vunpack.c.l.b16 %v582_v46 }
 0x15f   : > { %v590_v49 = vpack.c.b16 %v589_v48, %v588_v47 }
 0x161   : > { %648 = vmatmul.bf16.vlgmr.msra.gmra.mxu2 %v590_v49 }
 0x1e4   : > { %v649_v56 = vpop.f32.mrf.mxu2 }
 0x1e5   : > { %v650_v57 = vadd.f32 %v1145_v55, %v649_v56 }
 0x1e7   : > { %v654_v58 = vmax.f32 %v650_v57, 0.0 }
 0x1e9   : > { %v656_v61 = vpack.c.bf16 %v654_v58, %v654_v58 }
 0x1eb   : > { %v680_v0 = vunpack.c.l.b16 %v656_v61 }
 0x1ec   : > { %v651_v59 = vpop.f32.mrf.mxu2 }
 0x1ed   : > { %v652_v60 = vadd.f32 %v1145_v55, %v651_v59 }
 0x1ef   : > { %v655_v62 = vmax.f32 %v652_v60, 0.0 }
 0x1f1   : > { %v657_v63 = vpack.c.bf16 %v655_v62, %v655_v62 }
 0x1f3   : > { %v681_v1 = vunpack.c.l.b16 %v657_v63 }
 0x1f5   : > { %v682_v2 = vpack.c.b16 %v681_v1, %v680_v0 }
 0x1f7   : > { %740 = vmatmul.bf16.vlgmr.msra.gmra.mxu3 %v682_v2 }
 0x27a   : > { %v741_v4 = vpop.f32.mrf.mxu3 }
 0x27b   : > { %v742_v5 = vadd.f32 %v1146_v3, %v741_v4 }
 0x27d   : > { %747 = vst.msk [vmem:[%s378_s17] sm:$0xff] %vm746_vm1, %v742_v5 }
 0x282   : > { %v743_v6 = vpop.f32.mrf.mxu3 }
 0x283   : > { %v744_v7 = vadd.f32 %v1146_v3, %v743_v6 }
 0x285   : > { %748 = vst.msk [vmem:[%s378_s17 + $0x8] sm:$0xff] %vm746_vm1, %v744_v7 }
 0x286   : > { %1204 = shalt.err (!%p1201_p7)
}
 0x287   : > { %s1247_s22 = smov 128   ;;  %s1248_s9 = smov 8  }
 0x288   : > { %1095 = dma.vmem_to_hbm [thread:$0]  (%p1339_p11), %s763_s12, 256, %s765_s11, %s750_s18, %s1247_s22, %s1247_s22, %s1248_s9  }
 0x289 PF: > { %s779_s23 = sand.u32 1, %s1231_s24   ;;  %p1496_p5 = scmp.ge.s32.totalorder %s1243_s27, 2 }
 0x28a   : > { %s780_s29 = scalar_lea.sflag [#allocation4], %s779_s23 }
 0x28b   : > { %p1102_p8 = pnand %p1496_p5, %p1343_p12 }
 0x28d   : > { %p1103_p10 = pneg %p1102_p8 }
 0x28f   : > { %1226 = dma.done.wait (%p1103_p10), %s780_s29, 256  }
 0x290   : > { %1228 = vsyncadd (%p1103_p10), %s780_s29, 4294967040  ;;  %s1497_s8 = sld [smem:[#allocation8_spill]]  ;;  %p20_p2 = scmp.ge.s32.totalorder %s1314_s30, 4  }
 0x291   : > { %s1498_s24 = smov %s1235_s25  ;;  %s1499_s25 = smov %s1239_s26 }
 0x292   : > { %s1501_s27 = smov %s1314_s30  ;;  %22 = sbr.rel (!%p20_p2) target bundleno = 5 (0x5), region = 113 }
 0x296   : > { %s1500_s26 = smov %s1497_s8 }
 0x297   :  { %786 = vsyncpa [#allocation3], 1 }
 0x298   :  { %788 = vsyncpa [#allocation3 + $0x1], 1 }
 0x299   :  { %789 = vsyncpa [#allocation4], 1 }
 0x29a   :  { %791 = vsyncpa [#allocation4 + $0x1], 1 }

</bundles_post_ra>
